<compile_context>
chip_gen: v6e
topology: v6e:2x2x1
jax: 0.10.0
libtpu: 0.0.40
codegen_flags: <defaults>
</compile_context>

<pallas_src>
import functools
import math

import jax
import jax.numpy as jnp
from jax import lax
from jax.experimental import pallas as pl
from jax.experimental.pallas import tpu as pltpu


def _mha_kernel(x_ref, w_ref, *rest, num_heads, head_dim):
    # x_ref:    (B, S, E)       bf16 input (whole batch, one block)
    # w_ref:    (E, 3*H*D)      bf16 fused [Q | K | V] weights, 1/sqrt(D) in Q cols
    # mask_ref: (B, S, S) int8  (optional) nonzero = keep
    # o_ref:    (B, S, H*D)     head-concatenated output
    if len(rest) == 2:
        mask_ref, o_ref = rest
    else:
        (o_ref,) = rest
        mask_ref = None

    H, D = num_heads, head_dim
    HD = H * D
    B, S, E = x_ref.shape

    # One fused, lane-dense projection matmul for the whole batch on the MXU.
    # Leading-dim collapse (B,S,E)->(B*S,E) is layout-preserving (S % 8 == 0).
    x = x_ref[...].reshape(B * S, E)
    qkv = jnp.dot(x, w_ref[...], preferred_element_type=jnp.float32)
    qkv = qkv.astype(jnp.bfloat16)          # bf16 operands for downstream MXU matmuls

    neg = jnp.float32(-1e9)
    for b in range(B):                      # static unroll; tiny B (grid axis at scale)
        r0 = b * S                          # sublane-aligned row window
        keep = None if mask_ref is None else (mask_ref[b] != 0)          # (S, S) bool
        for h in range(H):
            q = qkv[r0:r0 + S, h * D:(h + 1) * D]                        # (S, D)
            k = qkv[r0:r0 + S, HD + h * D:HD + (h + 1) * D]
            v = qkv[r0:r0 + S, 2 * HD + h * D:2 * HD + (h + 1) * D]

            # Contract last dims of q and k -> no materialized k.T / XLU transpose.
            s = lax.dot_general(q, k, (((1,), (1,)), ((), ())),
                                preferred_element_type=jnp.float32)      # (S, S) f32
            if keep is not None:
                s = jnp.where(keep, s, neg)            # masked_fill(mask == 0, -inf)

            # Numerically-stable softmax in f32; normalization deferred past PV.
            m = jnp.max(s, axis=-1, keepdims=True)
            e = jnp.exp(s - m)
            denom = jnp.sum(e, axis=-1, keepdims=True)                   # (S, 1)

            o = jnp.dot(e.astype(jnp.bfloat16), v,
                        preferred_element_type=jnp.float32)              # (S, D)
            o = o * pl.reciprocal(denom, approx=True)                    # EUP slot

            # Direct per-head store: no list + lane-concatenate epilogue.
            o_ref[b, :, h * D:(h + 1) * D] = o.astype(o_ref.dtype)


def pack_qkv_weights(wq, wk, wv):
    """Fuse per-head (H, E, D) Q/K/V weights into one (E, 3*H*D) bf16 matrix.

    Columns are [Q_h0..Q_h{H-1} | K_h0.. | V_h0..]; 1/sqrt(D) is folded into the
    Q columns.  Call ONCE at parameter-init time, not per forward."""
    H, E, D = wq.shape
    scale = 1.0 / math.sqrt(D)

    def _fuse(w):  # (H, E, D) -> (E, H*D)
        return jnp.transpose(w, (1, 0, 2)).reshape(E, H * D)

    w = jnp.concatenate([_fuse(wq) * scale, _fuse(wk), _fuse(wv)], axis=-1)
    return w.astype(jnp.bfloat16)


def multi_head_attention(x, w_fused, num_heads, head_dim, mask=None):
    """x: (B, S, E) or (S, E); w_fused: (E, 3*H*D) from pack_qkv_weights;
    mask: (B, S, S), (S, S) or None (nonzero = keep).

    Returns (B, S, H*D) (or (S, H*D) if x was unbatched), matching
    torch.concat([head(x, mask) for head in heads], dim=-1)."""
    squeeze_batch = False
    if x.ndim == 2:
        x = x[None]
        squeeze_batch = True
    B, S, E = x.shape
    H, D = num_heads, head_dim
    HD = H * D

    x_bf = x.astype(jnp.bfloat16)
    kernel = functools.partial(_mha_kernel, num_heads=H, head_dim=D)

    in_specs = [
        pl.BlockSpec((B, S, E), lambda i: (0, 0, 0)),        # x, whole batch
        pl.BlockSpec((E, 3 * HD), lambda i: (0, 0)),         # fused weights
    ]
    args = [x_bf, w_fused]
    bytes_accessed = (x_bf.size * 2 + w_fused.size * 2
                      + B * S * HD * jnp.dtype(x.dtype).itemsize)

    if mask is not None:
        if mask.ndim == 2:
            mask = jnp.broadcast_to(mask[None], (B, S, S))
        mask_i8 = (mask != 0).astype(jnp.int8)               # int8, not f32
        in_specs.append(pl.BlockSpec((B, S, S), lambda i: (0, 0, 0)))
        args.append(mask_i8)
        bytes_accessed += B * S * S

    cost = pl.CostEstimate(
        flops=2 * B * S * E * 3 * HD + 4 * B * H * S * S * D,
        transcendentals=B * H * S * S,
        bytes_accessed=int(bytes_accessed))

    out = pl.pallas_call(
        kernel,
        out_shape=jax.ShapeDtypeStruct((B, S, HD), x.dtype),
        grid_spec=pltpu.PrefetchScalarGridSpec(
            num_scalar_prefetch=0,
            grid=(1,),                                       # single step: whole batch
            in_specs=in_specs,
            out_specs=pl.BlockSpec((B, S, HD), lambda i: (0, 0, 0)),
        ),
        compiler_params=pltpu.CompilerParams(
            dimension_semantics=("arbitrary",)),
        cost_estimate=cost,
    )(*args)

    if squeeze_batch:
        out = out[0]
    return out


def _reference(x, wq, wk, wv, mask):
    # pure-JAX f32 reference matching the PyTorch module semantics
    q = jnp.einsum("bse,hed->bhsd", x, wq)
    k = jnp.einsum("bse,hed->bhsd", x, wk)
    v = jnp.einsum("bse,hed->bhsd", x, wv)
    d = q.shape[-1]
    scores = jnp.einsum("bhqd,bhkd->bhqk", q, k) / math.sqrt(d)
    if mask is not None:
        scores = jnp.where(mask[:, None, :, :] == 0.0, -1e9, scores)
    attn = jax.nn.softmax(scores, axis=-1)
    out = jnp.einsum("bhqk,bhkd->bhqd", attn, v)
    B, H, S, D = out.shape
    return jnp.transpose(out, (0, 2, 1, 3)).reshape(B, S, H * D)


if __name__ == "__main__":
    # Small shapes consistent with the module's forward signature:
    # x: (batch, seq, embed), mask: (batch, seq, seq)
    B, S, E = 2, 8, 32
    H, D = 2, 16                      # 2 attention heads, head_dim = 16

    key = jax.random.PRNGKey(0)
    kx, kq, kk, kv = jax.random.split(key, 4)

    x = jax.random.normal(kx, (B, S, E), dtype=jnp.float32)
    # deterministic causal-style lower-triangular keep mask
    mask = jnp.tril(jnp.ones((S, S), dtype=jnp.float32))[None].repeat(B, axis=0)

    # deterministic per-head Q/K/V projection weights (no bias)
    wq = jax.random.normal(kq, (H, E, D), dtype=jnp.float32) * (1.0 / math.sqrt(E))
    wk = jax.random.normal(kk, (H, E, D), dtype=jnp.float32) * (1.0 / math.sqrt(E))
    wv = jax.random.normal(kv, (H, E, D), dtype=jnp.float32) * (1.0 / math.sqrt(E))

    # Weight fusion done once (parameter-init time), outside the forward path.
    w_fused = pack_qkv_weights(wq, wk, wv)

    # masked path
    out = multi_head_attention(x, w_fused, H, D, mask)
    out = jax.block_until_ready(out)
    ref = _reference(x, wq, wk, wv, mask)
    assert out.shape == (B, S, H * D)
    # tolerance accounts for bf16 MXU operands + approx reciprocal normalization
    assert jnp.allclose(out, ref, atol=5e-2, rtol=5e-2)

    # mask=None path (no mask traffic streamed at all)
    out_nm = multi_head_attention(x, w_fused, H, D, None)
    out_nm = jax.block_until_ready(out_nm)
    ref_nm = _reference(x, wq, wk, wv, None)
    assert jnp.allclose(out_nm, ref_nm, atol=5e-2, rtol=5e-2)

    print("KERNEL_OK")
</pallas_src>

<mosaic_0001>
module attributes {stable_mosaic.version = 11 : i64} {
  func.func @_mha_kernel(%arg0: i32, %arg1: memref<2x8x32xbf16, #tpu.memory_space<vmem>>, %arg2: memref<32x96xbf16, #tpu.memory_space<vmem>>, %arg3: memref<2x8x8xi8, #tpu.memory_space<vmem>>, %arg4: memref<2x8x32xf32, #tpu.memory_space<vmem>>) attributes {dimension_semantics = [#tpu.dimension_semantics<arbitrary>], iteration_bounds = array<i64: 1>, scalar_prefetch = 0 : i64, scratch_operands = 0 : i64, tpu.core_type = #tpu.core_type<tc>, window_params = [{pipeline_mode = #tpu.pipeline_mode<synchronous>, transform_indices = @transform_0, window_bounds = array<i64: 2, 8, 32>}, {pipeline_mode = #tpu.pipeline_mode<synchronous>, transform_indices = @transform_1, window_bounds = array<i64: 32, 96>}, {pipeline_mode = #tpu.pipeline_mode<synchronous>, transform_indices = @transform_2, window_bounds = array<i64: 2, 8, 8>}, {pipeline_mode = #tpu.pipeline_mode<synchronous>, transform_indices = @transform_3, window_bounds = array<i64: 2, 8, 32>}]} {
    %c0 = arith.constant 0 : index
    %c0_0 = arith.constant 0 : index
    %c0_1 = arith.constant 0 : index
    %0 = vector.load %arg1[%c0, %c0_0, %c0_1] : memref<2x8x32xbf16, #tpu.memory_space<vmem>>, vector<2x8x32xbf16>
    %1 = vector.shape_cast %0 : vector<2x8x32xbf16> to vector<16x32xbf16>
    %c0_2 = arith.constant 0 : index
    %c0_3 = arith.constant 0 : index
    %2 = vector.load %arg2[%c0_2, %c0_3] : memref<32x96xbf16, #tpu.memory_space<vmem>>, vector<32x96xbf16>
    %cst = arith.constant dense<0.000000e+00> : vector<16x96xf32>
    %3 = tpu.matmul %1, %2, %cst {dimension_numbers = #tpu.dot_dimension_numbers<[1], [0], [0], [1], [0, 0, 1, 1], [], []>} : vector<16x32xbf16>, vector<32x96xbf16>, vector<16x96xf32> -> vector<16x96xf32>
    %4 = arith.truncf %3 : vector<16x96xf32> to vector<16x96xbf16>
    %c0_4 = arith.constant 0 : index
    %c0_5 = arith.constant 0 : index
    %c0_6 = arith.constant 0 : index
    %5 = vector.load %arg3[%c0_4, %c0_5, %c0_6] : memref<2x8x8xi8, #tpu.memory_space<vmem>>, vector<1x8x8xi8>
    %6 = vector.shape_cast %5 : vector<1x8x8xi8> to vector<8x8xi8>
    %c0_i8 = arith.constant 0 : i8
    %7 = vector.broadcast %c0_i8 : i8 to vector<8x8xi8>
    %8 = arith.cmpi ne, %6, %7 : vector<8x8xi8>
    %9 = vector.extract_strided_slice %4 {offsets = [0, 0], sizes = [8, 16], strides = [1, 1]} : vector<16x96xbf16> to vector<8x16xbf16>
    %10 = vector.extract_strided_slice %4 {offsets = [0, 32], sizes = [8, 16], strides = [1, 1]} : vector<16x96xbf16> to vector<8x16xbf16>
    %11 = vector.extract_strided_slice %4 {offsets = [0, 64], sizes = [8, 16], strides = [1, 1]} : vector<16x96xbf16> to vector<8x16xbf16>
    %cst_7 = arith.constant dense<0.000000e+00> : vector<8x8xf32>
    %12 = tpu.matmul %9, %10, %cst_7 {dimension_numbers = #tpu.dot_dimension_numbers<[1], [1], [0], [0], [0, 0, 1, 0], [], []>} : vector<8x16xbf16>, vector<8x16xbf16>, vector<8x8xf32> -> vector<8x8xf32>
    %cst_8 = arith.constant -1.000000e+09 : f32
    %13 = vector.broadcast %cst_8 : f32 to vector<8x8xf32>
    %14 = arith.select %8, %12, %13 : vector<8x8xi1>, vector<8x8xf32>
    %cst_9 = arith.constant dense<0xFF800000> : vector<8xf32>
    %15 = vector.multi_reduction <maximumf>, %14, %cst_9 [1] : vector<8x8xf32> to vector<8xf32>
    %16 = vector.shape_cast %15 : vector<8xf32> to vector<8x1xf32>
    %17 = vector.broadcast %16 : vector<8x1xf32> to vector<8x8xf32>
    %18 = arith.subf %14, %17 : vector<8x8xf32>
    %19 = math.exp %18 : vector<8x8xf32>
    %cst_10 = arith.constant dense<0.000000e+00> : vector<8xf32>
    %20 = vector.multi_reduction <add>, %19, %cst_10 [1] : vector<8x8xf32> to vector<8xf32>
    %21 = vector.shape_cast %20 : vector<8xf32> to vector<8x1xf32>
    %22 = arith.truncf %19 : vector<8x8xf32> to vector<8x8xbf16>
    %cst_11 = arith.constant dense<0.000000e+00> : vector<8x16xf32>
    %23 = tpu.matmul %22, %11, %cst_11 {dimension_numbers = #tpu.dot_dimension_numbers<[1], [0], [0], [1], [0, 0, 1, 1], [], []>} : vector<8x8xbf16>, vector<8x16xbf16>, vector<8x16xf32> -> vector<8x16xf32>
    %24 = tpu.reciprocal %21 {approx = true} : vector<8x1xf32> -> vector<8x1xf32>
    %25 = vector.broadcast %24 : vector<8x1xf32> to vector<8x16xf32>
    %26 = arith.mulf %23, %25 : vector<8x16xf32>
    %c0_12 = arith.constant 0 : index
    %c0_13 = arith.constant 0 : index
    %c0_14 = arith.constant 0 : index
    %27 = vector.load %arg4[%c0_12, %c0_13, %c0_14] : memref<2x8x32xf32, #tpu.memory_space<vmem>>, vector<1x8x16xf32>
    %28 = vector.shape_cast %27 : vector<1x8x16xf32> to vector<8x16xf32>
    %29 = vector.shape_cast %26 : vector<8x16xf32> to vector<1x8x16xf32>
    tpu.vector_store %arg4[%c0_12, %c0_13, %c0_14], %29 {strides = array<i32>} : memref<2x8x32xf32, #tpu.memory_space<vmem>>, vector<1x8x16xf32>,
    %30 = vector.extract_strided_slice %4 {offsets = [0, 16], sizes = [8, 16], strides = [1, 1]} : vector<16x96xbf16> to vector<8x16xbf16>
    %31 = vector.extract_strided_slice %4 {offsets = [0, 48], sizes = [8, 16], strides = [1, 1]} : vector<16x96xbf16> to vector<8x16xbf16>
    %32 = vector.extract_strided_slice %4 {offsets = [0, 80], sizes = [8, 16], strides = [1, 1]} : vector<16x96xbf16> to vector<8x16xbf16>
    %cst_15 = arith.constant dense<0.000000e+00> : vector<8x8xf32>
    %33 = tpu.matmul %30, %31, %cst_15 {dimension_numbers = #tpu.dot_dimension_numbers<[1], [1], [0], [0], [0, 0, 1, 0], [], []>} : vector<8x16xbf16>, vector<8x16xbf16>, vector<8x8xf32> -> vector<8x8xf32>
    %cst_16 = arith.constant -1.000000e+09 : f32
    %34 = vector.broadcast %cst_16 : f32 to vector<8x8xf32>
    %35 = arith.select %8, %33, %34 : vector<8x8xi1>, vector<8x8xf32>
    %cst_17 = arith.constant dense<0xFF800000> : vector<8xf32>
    %36 = vector.multi_reduction <maximumf>, %35, %cst_17 [1] : vector<8x8xf32> to vector<8xf32>
    %37 = vector.shape_cast %36 : vector<8xf32> to vector<8x1xf32>
    %38 = vector.broadcast %37 : vector<8x1xf32> to vector<8x8xf32>
    %39 = arith.subf %35, %38 : vector<8x8xf32>
    %40 = math.exp %39 : vector<8x8xf32>
    %cst_18 = arith.constant dense<0.000000e+00> : vector<8xf32>
    %41 = vector.multi_reduction <add>, %40, %cst_18 [1] : vector<8x8xf32> to vector<8xf32>
    %42 = vector.shape_cast %41 : vector<8xf32> to vector<8x1xf32>
    %43 = arith.truncf %40 : vector<8x8xf32> to vector<8x8xbf16>
    %cst_19 = arith.constant dense<0.000000e+00> : vector<8x16xf32>
    %44 = tpu.matmul %43, %32, %cst_19 {dimension_numbers = #tpu.dot_dimension_numbers<[1], [0], [0], [1], [0, 0, 1, 1], [], []>} : vector<8x8xbf16>, vector<8x16xbf16>, vector<8x16xf32> -> vector<8x16xf32>
    %45 = tpu.reciprocal %42 {approx = true} : vector<8x1xf32> -> vector<8x1xf32>
    %46 = vector.broadcast %45 : vector<8x1xf32> to vector<8x16xf32>
    %47 = arith.mulf %44, %46 : vector<8x16xf32>
    %c0_20 = arith.constant 0 : index
    %c0_21 = arith.constant 0 : index
    %c16 = arith.constant 16 : index
    %48 = vector.load %arg4[%c0_20, %c0_21, %c16] : memref<2x8x32xf32, #tpu.memory_space<vmem>>, vector<1x8x16xf32>
    %49 = vector.shape_cast %48 : vector<1x8x16xf32> to vector<8x16xf32>
    %50 = vector.shape_cast %47 : vector<8x16xf32> to vector<1x8x16xf32>
    tpu.vector_store %arg4[%c0_20, %c0_21, %c16], %50 {strides = array<i32>} : memref<2x8x32xf32, #tpu.memory_space<vmem>>, vector<1x8x16xf32>,
    %c1 = arith.constant 1 : index
    %c0_22 = arith.constant 0 : index
    %c0_23 = arith.constant 0 : index
    %51 = vector.load %arg3[%c1, %c0_22, %c0_23] : memref<2x8x8xi8, #tpu.memory_space<vmem>>, vector<1x8x8xi8>
    %52 = vector.shape_cast %51 : vector<1x8x8xi8> to vector<8x8xi8>
    %c0_i8_24 = arith.constant 0 : i8
    %53 = vector.broadcast %c0_i8_24 : i8 to vector<8x8xi8>
    %54 = arith.cmpi ne, %52, %53 : vector<8x8xi8>
    %55 = vector.extract_strided_slice %4 {offsets = [8, 0], sizes = [8, 16], strides = [1, 1]} : vector<16x96xbf16> to vector<8x16xbf16>
    %56 = vector.extract_strided_slice %4 {offsets = [8, 32], sizes = [8, 16], strides = [1, 1]} : vector<16x96xbf16> to vector<8x16xbf16>
    %57 = vector.extract_strided_slice %4 {offsets = [8, 64], sizes = [8, 16], strides = [1, 1]} : vector<16x96xbf16> to vector<8x16xbf16>
    %cst_25 = arith.constant dense<0.000000e+00> : vector<8x8xf32>
    %58 = tpu.matmul %55, %56, %cst_25 {dimension_numbers = #tpu.dot_dimension_numbers<[1], [1], [0], [0], [0, 0, 1, 0], [], []>} : vector<8x16xbf16>, vector<8x16xbf16>, vector<8x8xf32> -> vector<8x8xf32>
    %cst_26 = arith.constant -1.000000e+09 : f32
    %59 = vector.broadcast %cst_26 : f32 to vector<8x8xf32>
    %60 = arith.select %54, %58, %59 : vector<8x8xi1>, vector<8x8xf32>
    %cst_27 = arith.constant dense<0xFF800000> : vector<8xf32>
    %61 = vector.multi_reduction <maximumf>, %60, %cst_27 [1] : vector<8x8xf32> to vector<8xf32>
    %62 = vector.shape_cast %61 : vector<8xf32> to vector<8x1xf32>
    %63 = vector.broadcast %62 : vector<8x1xf32> to vector<8x8xf32>
    %64 = arith.subf %60, %63 : vector<8x8xf32>
    %65 = math.exp %64 : vector<8x8xf32>
    %cst_28 = arith.constant dense<0.000000e+00> : vector<8xf32>
    %66 = vector.multi_reduction <add>, %65, %cst_28 [1] : vector<8x8xf32> to vector<8xf32>
    %67 = vector.shape_cast %66 : vector<8xf32> to vector<8x1xf32>
    %68 = arith.truncf %65 : vector<8x8xf32> to vector<8x8xbf16>
    %cst_29 = arith.constant dense<0.000000e+00> : vector<8x16xf32>
    %69 = tpu.matmul %68, %57, %cst_29 {dimension_numbers = #tpu.dot_dimension_numbers<[1], [0], [0], [1], [0, 0, 1, 1], [], []>} : vector<8x8xbf16>, vector<8x16xbf16>, vector<8x16xf32> -> vector<8x16xf32>
    %70 = tpu.reciprocal %67 {approx = true} : vector<8x1xf32> -> vector<8x1xf32>
    %71 = vector.broadcast %70 : vector<8x1xf32> to vector<8x16xf32>
    %72 = arith.mulf %69, %71 : vector<8x16xf32>
    %c1_30 = arith.constant 1 : index
    %c0_31 = arith.constant 0 : index
    %c0_32 = arith.constant 0 : index
    %73 = vector.load %arg4[%c1_30, %c0_31, %c0_32] : memref<2x8x32xf32, #tpu.memory_space<vmem>>, vector<1x8x16xf32>
    %74 = vector.shape_cast %73 : vector<1x8x16xf32> to vector<8x16xf32>
    %75 = vector.shape_cast %72 : vector<8x16xf32> to vector<1x8x16xf32>
    tpu.vector_store %arg4[%c1_30, %c0_31, %c0_32], %75 {strides = array<i32>} : memref<2x8x32xf32, #tpu.memory_space<vmem>>, vector<1x8x16xf32>,
    %76 = vector.extract_strided_slice %4 {offsets = [8, 16], sizes = [8, 16], strides = [1, 1]} : vector<16x96xbf16> to vector<8x16xbf16>
    %77 = vector.extract_strided_slice %4 {offsets = [8, 48], sizes = [8, 16], strides = [1, 1]} : vector<16x96xbf16> to vector<8x16xbf16>
    %78 = vector.extract_strided_slice %4 {offsets = [8, 80], sizes = [8, 16], strides = [1, 1]} : vector<16x96xbf16> to vector<8x16xbf16>
    %cst_33 = arith.constant dense<0.000000e+00> : vector<8x8xf32>
    %79 = tpu.matmul %76, %77, %cst_33 {dimension_numbers = #tpu.dot_dimension_numbers<[1], [1], [0], [0], [0, 0, 1, 0], [], []>} : vector<8x16xbf16>, vector<8x16xbf16>, vector<8x8xf32> -> vector<8x8xf32>
    %cst_34 = arith.constant -1.000000e+09 : f32
    %80 = vector.broadcast %cst_34 : f32 to vector<8x8xf32>
    %81 = arith.select %54, %79, %80 : vector<8x8xi1>, vector<8x8xf32>
    %cst_35 = arith.constant dense<0xFF800000> : vector<8xf32>
    %82 = vector.multi_reduction <maximumf>, %81, %cst_35 [1] : vector<8x8xf32> to vector<8xf32>
    %83 = vector.shape_cast %82 : vector<8xf32> to vector<8x1xf32>
    %84 = vector.broadcast %83 : vector<8x1xf32> to vector<8x8xf32>
    %85 = arith.subf %81, %84 : vector<8x8xf32>
    %86 = math.exp %85 : vector<8x8xf32>
    %cst_36 = arith.constant dense<0.000000e+00> : vector<8xf32>
    %87 = vector.multi_reduction <add>, %86, %cst_36 [1] : vector<8x8xf32> to vector<8xf32>
    %88 = vector.shape_cast %87 : vector<8xf32> to vector<8x1xf32>
    %89 = arith.truncf %86 : vector<8x8xf32> to vector<8x8xbf16>
    %cst_37 = arith.constant dense<0.000000e+00> : vector<8x16xf32>
    %90 = tpu.matmul %89, %78, %cst_37 {dimension_numbers = #tpu.dot_dimension_numbers<[1], [0], [0], [1], [0, 0, 1, 1], [], []>} : vector<8x8xbf16>, vector<8x16xbf16>, vector<8x16xf32> -> vector<8x16xf32>
    %91 = tpu.reciprocal %88 {approx = true} : vector<8x1xf32> -> vector<8x1xf32>
    %92 = vector.broadcast %91 : vector<8x1xf32> to vector<8x16xf32>
    %93 = arith.mulf %90, %92 : vector<8x16xf32>
    %c1_38 = arith.constant 1 : index
    %c0_39 = arith.constant 0 : index
    %c16_40 = arith.constant 16 : index
    %94 = vector.load %arg4[%c1_38, %c0_39, %c16_40] : memref<2x8x32xf32, #tpu.memory_space<vmem>>, vector<1x8x16xf32>
    %95 = vector.shape_cast %94 : vector<1x8x16xf32> to vector<8x16xf32>
    %96 = vector.shape_cast %93 : vector<8x16xf32> to vector<1x8x16xf32>
    tpu.vector_store %arg4[%c1_38, %c0_39, %c16_40], %96 {strides = array<i32>} : memref<2x8x32xf32, #tpu.memory_space<vmem>>, vector<1x8x16xf32>,
    return
  }
  func.func @transform_0(%arg0: i32) -> (i32, i32, i32) {
    %c0_i32 = arith.constant 0 : i32
    %c0_i32_0 = arith.constant 0 : i32
    %c0_i32_1 = arith.constant 0 : i32
    %c0_i32_2 = arith.constant 0 : i32
    return %c0_i32, %c0_i32_0, %c0_i32_1 : i32, i32, i32
  }
  func.func @transform_1(%arg0: i32) -> (i32, i32) {
    %c0_i32 = arith.constant 0 : i32
    %c0_i32_0 = arith.constant 0 : i32
    %c0_i32_1 = arith.constant 0 : i32
    return %c0_i32, %c0_i32_0 : i32, i32
  }
  func.func @transform_2(%arg0: i32) -> (i32, i32, i32) {
    %c0_i32 = arith.constant 0 : i32
    %c0_i32_0 = arith.constant 0 : i32
    %c0_i32_1 = arith.constant 0 : i32
    %c0_i32_2 = arith.constant 0 : i32
    return %c0_i32, %c0_i32_0, %c0_i32_1 : i32, i32, i32
  }
  func.func @transform_3(%arg0: i32) -> (i32, i32, i32) {
    %c0_i32 = arith.constant 0 : i32
    %c0_i32_0 = arith.constant 0 : i32
    %c0_i32_1 = arith.constant 0 : i32
    %c0_i32_2 = arith.constant 0 : i32
    return %c0_i32, %c0_i32_0, %c0_i32_1 : i32, i32, i32
  }
}

</mosaic_0001>

<bundles_post_ra>
// kernel: tpu_custom_call.1
= control target key start
LH: loop header
LB: loop body
LE: loop exit
PB: predicated region body
PF: predicated region fallthrough
CT: control target
= control target key end

     0   :  { %8 = vsyncpa [#allocation3], 0  ;;  %s953_s0 = inlined_call_operand.hbm [shape: bf16[2,8,32], index: 0, kind: input, shape index: {}]   ;;  %s954_s1 = inlined_call_operand.hbm [shape: bf16[32,96], index: 1, kind: input, shape index: {}]   ;;  %s955_s2 = inlined_call_operand.hbm [shape: s8[2,8,8], index: 2, kind: input, shape index: {}]   ;;  %s956_s3 = inlined_call_operand.hbm [shape: f32[2,8,32], index: 3, kind: output, shape index: {}]  }
   0x1   :  { %9 = vsyncpa [#allocation6], 0 }
   0x2   :  { %10 = vsyncpa [#allocation4], 0  ;;  %s826_s12 = smov [#allocation5]   ;;  %s827_s14 = smov [#allocation2]  }
   0x3   :  { %s28_s13 = sshll.u32 %s826_s12, 4  ;;  %s16_s15 = sshll.u32 %s827_s14, 4  ;;  %s29_s13 = int_to_ptr.vmem [resolvable:$true] %s28_s13  ;;  %s17_s15 = int_to_ptr.vmem [resolvable:$true] %s16_s15 }
   0x4   :  { %s748_s16 = scalar_lea.vmem %s29_s13, 256  ;;  %p753_p1 = scmp.lt.s32.totalorder %s29_s13, %s29_s13 }
   0x5   :  { %p749_p0 = scmp.ne.s32.totalorder %s29_s13, %s748_s16  ;;  %p754_p2 = scmp.lt.s32.totalorder %s748_s16, %s748_s16 }
   0x7   :  { %p755_p3 = por %p754_p2, %p753_p1 }
   0x9   :  { %p756_p4 = pnand %p755_p3, %p749_p0 }
   0xb   :  { %759 = shalt.err (!%p756_p4)
}
   0xc   :  { %s828_s17 = smov 64   ;;  %s829_s18 = smov 4  }
   0xd   :  { %34 = dma.hbm_to_vmem [thread:$0]  %s954_s1, 256, %s29_s13, [#allocation6], %s828_s17, %s828_s17, %s829_s18  }
   0xe   :  { %s768_s21 = scalar_lea.vmem %s17_s15, 128  ;;  %p773_p6 = scmp.lt.s32.totalorder %s17_s15, %s17_s15 }
   0xf   :  { %p769_p5 = scmp.ne.s32.totalorder %s17_s15, %s768_s21  ;;  %p774_p7 = scmp.lt.s32.totalorder %s768_s21, %s768_s21 }
  0x11   :  { %p775_p8 = por %p774_p7, %p773_p6 }
  0x13   :  { %p776_p9 = pnand %p775_p8, %p769_p5 }
  0x15   :  { %779 = shalt.err (!%p776_p9)
}
  0x16   :  { %22 = dma.hbm_to_vmem [thread:$0]  %s953_s0, 128, %s17_s15, [#allocation3], %s828_s17, %s828_s17, %s829_s18  }
  0x17   :  { %s830_s24 = smov [#allocation7]  }
  0x18   :  { %s40_s25 = sshll.u32 %s830_s24, 4  ;;  %s41_s25 = int_to_ptr.vmem [resolvable:$true] %s40_s25 }
  0x19   :  { %s788_s26 = scalar_lea.vmem %s41_s25, 64  ;;  %p793_p11 = scmp.lt.s32.totalorder %s41_s25, %s41_s25 }
  0x1a   :  { %p789_p10 = scmp.ne.s32.totalorder %s41_s25, %s788_s26  ;;  %p794_p12 = scmp.lt.s32.totalorder %s788_s26, %s788_s26 }
  0x1c   :  { %p795_p13 = por %p794_p12, %p793_p11 }
  0x1e   :  { %p796_p0 = pnand %p795_p13, %p789_p10 }
  0x20   :  { %799 = shalt.err (!%p796_p0)
}
  0x21   :  { %s831_s1 = smov 32   ;;  %s832_s27 = smov 2  }
  0x22   :  { %46 = dma.hbm_to_vmem [thread:$0]  %s955_s2, 64, %s41_s25, [#allocation6], %s831_s1, %s831_s1, %s832_s27  }
  0x23   :  { %820 = dma.done.wait [#allocation3], 128  }
  0x24   :  { %821 = vsyncadd [#allocation3], 4294967168 }
  0x25   :  { %822 = dma.done.wait [#allocation6], 320  }
  0x26   :  { %823 = vsyncadd [#allocation6], 4294966976  ;;  %v833_v0 = vmov 0.0   ;;  %vm834_vm0 = vmmov 0   ;;  %v721_v1 = vld [vmem:[#allocation5 + $0x8] sm:$0xff]   ;;  %v722_v2 = vld [vmem:[#allocation5] sm:$0xff]  }
  0x27   :  { %647 = vmatprep.subr.bf16.mxu0 %v833_v0  ;;  %651 = vmatprep.mubr.msk.bf16.mxu0 %vm834_vm0, %v833_v0  ;;  %v723_v3 = vld [vmem:[#allocation2] sm:$0xff]   ;;  %vm82_vm1 = vcmask 261120   ;;  %s835_s0 = smov 112   ;;  %s836_s2 = smov 96   ;;  %vm133_vm2 = vcmask 130048   ;;  %vm200_vm3 = vcmask 1043456  }
  0x28   :  { %655 = vmatprep.subr.bf16.mxu1 %v833_v0  ;;  %657 = vmatprep.mubr.msk.bf16.mxu1 %vm834_vm0, %v833_v0  ;;  %s837_s30 = smov 80   ;;  %v128_v22 = vld [vmem:[#allocation7] sm:$0x3]  ;;  %v838_v23 = vmov 0   ;;  %vm184_vm6 = vcmask 64512   ;;  %s839_s4 = smov 48  }
  0x29   :  { %648 = vmatpush3.bf16.msra.mxu0 %v721_v1  ;;  %vm129_vm4 = vnez %v128_v22  ;;  %v365_v28 = vld [vmem:[#allocation7 + $0x2] sm:$0x3]  ;;  %s840_s5 = smov 16   ;;  %vm362_vm9 = vcmask 261248   ;;  %s841_s6 = smov [#allocation8]  }
  0x2a   :  { %649 = vmatprep.subr.bf16.mxu0 %v833_v0  ;;  %v180_v24 = vsel %vm129_vm4, 16843009, %v838_v23  ;;  %vm366_vm7 = vnez %v365_v28  ;;  %s603_s7 = sshll.u32 %s841_s6, 4  ;;  %s604_s7 = int_to_ptr.vmem [resolvable:$true] %s603_s7 }
  0x2b   :  { %v181_v25 = vunpack.c.0.s8 %v180_v24  ;;  %v416_v33 = vsel %vm366_vm7, 16843009, %v838_v23  ;;  %s800_s8 = scalar_lea.vmem %s604_s7, 256  ;;  %p805_p2 = scmp.lt.s32.totalorder %s604_s7, %s604_s7 }
  0x2c   :  { %v417_v38 = vunpack.c.0.s8 %v416_v33  ;;  %p801_p1 = scmp.ne.s32.totalorder %s604_s7, %s800_s8  ;;  %p806_p3 = scmp.lt.s32.totalorder %s800_s8, %s800_s8 }
  0x2d   :  { %650 = vmatpush3.bf16.msra.mxu0 %v722_v2  ;;  %vm182_vm5 = vcmp.ne.s32.totalorder %v181_v25, 0 }
  0x2e   :  { %661 = vmatprep.subr.bf16.mxu0 %v833_v0  ;;  %vm418_vm8 = vcmp.ne.s32.totalorder %v417_v38, 0  ;;  %p807_p4 = por %p806_p3, %p805_p2 }
  0x30   :  { %652 = vmatmul.mubr.msk.bf16.vlgmr.msra.gmra.mxu0 %vm82_vm1, %v723_v3  ;;  %p808_p5 = pnand %p807_p4, %p801_p1 }
  0x31   :  { %663 = vmatprep.mubr.msk.bf16.mxu0 %vm834_vm0, %v833_v0 }
  0xf0   :  { %v120_v4 = vpop.f32.mrf.mxu0 }
  0xf2   :  { %v653_v5 = vpop.f32.mrf.mxu0 }
  0xf4   :  { %v123_v6 = vpop.f32.mrf.mxu0 }
  0xf5   :  { %v887_v7 = vpack.c.bf16 %v123_v6, %v120_v4 }
  0xf6   :  { %v654_v8 = vpop.f32.mrf.mxu0 }
  0xf7   :  { %247 = vrot.lane.b32.xlu1 %v887_v7, %s835_s0  ;;  %131 = vrot.lane.b32.xlu0 %v887_v7, %s836_s2  ;;  %v892_v9 = vrot.slane %v887_v7, 4 }
  0xfb   :  { %249 = vrot.lane.b32.xlu0 %v887_v7, %s837_s30  ;;  %368 = vrot.lane.b32.xlu1 %v892_v9, %s836_s2 }
  0xff   :  { %484 = vrot.lane.b32.xlu0 %v892_v9, %s837_s30  ;;  %482 = vrot.lane.b32.xlu1 %v892_v9, %s835_s0 }
 0x103   :  { %195 = vrot.lane.b32.xlu1 %v887_v7, %s828_s17 }
 0x169   :  { %v248_v10 = vpop.permute.xlu1 %247  ;;  %v132_v11 = vpop.permute.xlu0 %131 }
 0x16a   :  { %v138_v12 = vsel %vm133_vm2, %v132_v11, 0 }
 0x16b   :  { %656 = vmatpush3.bf16.xpose.msra.mxu1 %v138_v12 }
 0x16c   :  { %667 = vmatprep.subr.bf16.mxu1 %v833_v0 }
 0x16d   :  { %v369_v13 = vpop.permute.xlu1 %368  ;;  %v250_v14 = vpop.permute.xlu0 %249 }
 0x16e   :  { %v255_v16 = vsel %vm133_vm2, %v250_v14, 0  ;;  %v374_v19 = vsel %vm133_vm2, %v369_v13, 0 }
 0x171   :  { %v483_v15 = vpop.permute.xlu1 %482  ;;  %v485_v20 = vpop.permute.xlu0 %484 }
 0x172   :  { %658 = vmatmul.mubr.msk.bf16.vlgmr.msra.gmra.mxu1 %vm133_vm2, %v887_v7  ;;  %v490_v21 = vsel %vm133_vm2, %v485_v20, 0 }
 0x173   :  { %668 = vmatpush3.bf16.xpose.msra.mxu1 %v255_v16  ;;  %669 = vmatprep.mubr.msk.bf16.mxu1 %vm834_vm0, %v833_v0 }
 0x174   :  { %679 = vmatprep.subr.bf16.mxu1 %v833_v0 }
 0x175   :  { %v196_v17 = vpop.permute.xlu1 %195 }
 0x176   :  { %v202_v18 = vsel %vm200_vm3, %v196_v17, 0 }
 0x177   :  { %662 = vmatpush3.bf16.msra.mxu0 %v202_v18 }
 0x178   :  { %673 = vmatprep.subr.bf16.mxu0 %v833_v0 }
 0x17a   :  { %670 = vmatmul.mubr.msk.bf16.vlgmr.msra.gmra.mxu1 %vm133_vm2, %v248_v10 }
 0x17b   :  { %680 = vmatpush3.bf16.xpose.msra.mxu1 %v374_v19  ;;  %681 = vmatprep.mubr.msk.bf16.mxu1 %vm834_vm0, %v833_v0 }
 0x17c   :  { %691 = vmatprep.subr.bf16.mxu1 %v833_v0 }
 0x182   :  { %682 = vmatmul.mubr.msk.bf16.vlgmr.msra.gmra.mxu1 %vm133_vm2, %v892_v9 }
 0x183   :  { %692 = vmatpush3.bf16.xpose.msra.mxu1 %v490_v21  ;;  %693 = vmatprep.mubr.msk.bf16.mxu1 %vm834_vm0, %v833_v0 }
 0x18a   :  { %694 = vmatmul.mubr.msk.bf16.vlgmr.msra.gmra.mxu1 %vm133_vm2, %v483_v15 }
 0x232   :  { %v174_v26 = vpop.f32.mrf.mxu1 }
 0x233   :  { %v183_v27 = vsel %vm182_vm5, %v174_v26, -1e+09 }
 0x234   :  { %v659_v29 = vpop.f32.mrf.mxu1  ;;  %v185_v30 = vsel %vm184_vm6, %v183_v27, -inf }
 0x235   :  { %186 = vmax.xlane.f32.xlu0 %v185_v30 }
 0x236   :  { %v177_v31 = vpop.f32.mrf.mxu1 }
 0x238   :  { %v660_v32 = vpop.f32.mrf.mxu1 }
 0x23a   :  { %v291_v34 = vpop.f32.mrf.mxu1 }
 0x23b   :  { %v297_v35 = vsel %vm182_vm5, %v291_v34, -1e+09 }
 0x23c   :  { %v671_v36 = vpop.f32.mrf.mxu1  ;;  %v298_v37 = vsel %vm184_vm6, %v297_v35, -inf }
 0x23d   :  { %299 = vmax.xlane.f32.xlu1 %v298_v37 }
 0x23e   :  { %v294_v39 = vpop.f32.mrf.mxu1 }
 0x240   :  { %v672_v40 = vpop.f32.mrf.mxu1 }
 0x242   :  { %v410_v41 = vpop.f32.mrf.mxu1 }
 0x243   :  { %v419_v42 = vsel %vm418_vm8, %v410_v41, -1e+09 }
 0x244   :  { %v683_v43 = vpop.f32.mrf.mxu1  ;;  %v420_v44 = vsel %vm184_vm6, %v419_v42, -inf }
 0x245   :  { %421 = vmax.xlane.f32.xlu0 %v420_v44 }
 0x246   :  { %v413_v45 = vpop.f32.mrf.mxu1 }
 0x248   :  { %v684_v46 = vpop.f32.mrf.mxu1 }
 0x24a   :  { %v526_v47 = vpop.f32.mrf.mxu1 }
 0x24b   :  { %v532_v48 = vsel %vm418_vm8, %v526_v47, -1e+09 }
 0x24c   :  { %v695_v49 = vpop.f32.mrf.mxu1  ;;  %v533_v50 = vsel %vm184_vm6, %v532_v48, -inf }
 0x24d   :  { %534 = vmax.xlane.f32.xlu0 %v533_v50 }
 0x24e   :  { %430 = vrot.lane.b32.xlu1 %v892_v9, %s828_s17  ;;  %v529_v51 = vpop.f32.mrf.mxu1 }
 0x250   :  { %v696_v52 = vpop.f32.mrf.mxu1 }
 0x252   :  { %543 = vrot.lane.b32.xlu1 %v892_v9, %s839_s4 }
 0x263   :  { %308 = vrot.lane.b32.xlu0 %v887_v7, %s839_s4 }
 0x2be   :  { %v187_v53 = vpop.xlane.xlu0 %186 }
 0x2bf   :  { %v188_v54 = vsub.f32 %v183_v27, %v187_v53 }
 0x2c1   :  { %v189_v55 = vmul.f32 1.442695, %v188_v54 }
 0x2c3   :  { %724 = vpow2.f32 %v189_v55 }
 0x2c6   :  { %v300_v56 = vpop.xlane.xlu1 %299 }
 0x2c7   :  { %v301_v57 = vsub.f32 %v297_v35, %v300_v56 }
 0x2c9   :  { %v302_v58 = vmul.f32 1.442695, %v301_v57 }
 0x2ca   :  { %v431_v8 = vpop.permute.xlu1 %430 }
 0x2cb   :  { %726 = vpow2.f32 %v302_v58  ;;  %v436_v11 = vsel %vm200_vm3, %v431_v8, 0 }
 0x2ce   :  { %v422_v59 = vpop.xlane.xlu0 %421  ;;  %v544_v14 = vpop.permute.xlu1 %543 }
 0x2cf   :  { %v423_v60 = vsub.f32 %v419_v42, %v422_v59  ;;  %v549_v16 = vsel %vm200_vm3, %v544_v14, 0 }
 0x2d0   :  { %v725_v61 = vpop.eup %724 }
 0x2d1   :  { %v424_v62 = vmul.f32 1.442695, %v423_v60  ;;  %v194_v63 = vpack.c.bf16 %v725_v61, %v725_v61  ;;  %v191_v9 = vsel %vm184_vm6, %v725_v61, 0.0 }
 0x2d3   :  { %728 = vpow2.f32 %v424_v62  ;;  %664 = vmatmul.mubr.msk.bf16.vlgmr.msra.gmra.mxu0 %vm184_vm6, %v194_v63 }
 0x2d4   :  { %675 = vmatprep.mubr.msk.bf16.mxu0 %vm834_vm0, %v833_v0 }
 0x2d6   :  { %v535_v1 = vpop.xlane.xlu0 %534 }
 0x2d7   :  { %v536_v2 = vsub.f32 %v532_v48, %v535_v1 }
 0x2d8   :  { %v727_v3 = vpop.eup %726 }
 0x2d9   :  { %v537_v4 = vmul.f32 1.442695, %v536_v2  ;;  %v304_v5 = vsel %vm184_vm6, %v727_v3, 0.0  ;;  %v307_v10 = vpack.c.bf16 %v727_v3, %v727_v3 }
 0x2da   :  { %v309_v6 = vpop.permute.xlu0 %308  ;;  %305 = vadd.xlane.f32.xlu0 %v304_v5 }
 0x2db   :  { %730 = vpow2.f32 %v537_v4  ;;  %v314_v7 = vsel %vm200_vm3, %v309_v6, 0 }
 0x2dc   :  { %674 = vmatpush3.bf16.msra.mxu0 %v314_v7 }
 0x2dd   :  { %685 = vmatprep.subr.bf16.mxu0 %v833_v0 }
 0x2de   :  { %192 = vadd.xlane.f32.xlu0 %v191_v9 }
 0x2df   :  { %676 = vmatmul.mubr.msk.bf16.vlgmr.msra.gmra.mxu0 %vm184_vm6, %v307_v10 }
 0x2e0   :  { %v729_v12 = vpop.eup %728  ;;  %686 = vmatpush3.bf16.msra.mxu0 %v436_v11  ;;  %687 = vmatprep.mubr.msk.bf16.mxu0 %vm834_vm0, %v833_v0 }
 0x2e1   :  { %v426_v13 = vsel %vm184_vm6, %v729_v12, 0.0  ;;  %697 = vmatprep.subr.bf16.mxu0 %v833_v0  ;;  %v429_v15 = vpack.c.bf16 %v729_v12, %v729_v12 }
 0x2e2   :  { %427 = vadd.xlane.f32.xlu0 %v426_v13 }
 0x2e7   :  { %688 = vmatmul.mubr.msk.bf16.vlgmr.msra.gmra.mxu0 %vm184_vm6, %v429_v15 }
 0x2e8   :  { %v731_v17 = vpop.eup %730  ;;  %698 = vmatpush3.bf16.msra.mxu0 %v549_v16  ;;  %699 = vmatprep.mubr.msk.bf16.mxu0 %vm834_vm0, %v833_v0 }
 0x2e9   :  { %v539_v18 = vsel %vm184_vm6, %v731_v17, 0.0  ;;  %v542_v19 = vpack.c.bf16 %v731_v17, %v731_v17 }
 0x2ea   :  { %540 = vadd.xlane.f32.xlu1 %v539_v18 }
 0x2ef   :  { %700 = vmatmul.mubr.msk.bf16.vlgmr.msra.gmra.mxu0 %vm184_vm6, %v542_v19 }
 0x363   :  { %v306_v20 = vpop.xlane.xlu0 %305 }
 0x367   :  { %v193_v21 = vpop.xlane.xlu0 %192 }
 0x368   :  { %732 = vrcp.f32 %v193_v21 }
 0x369   :  { %734 = vrcp.f32 %v306_v20 }
 0x36b   :  { %v428_v26 = vpop.xlane.xlu0 %427 }
 0x36c   :  { %736 = vrcp.f32 %v428_v26 }
 0x373   :  { %v541_v29 = vpop.xlane.xlu1 %540 }
 0x374   :  { %738 = vrcp.f32 %v541_v29 }
 0x375   :  { %v733_v22 = vpop.eup %732 }
 0x376   :  { %v735_v0 = vpop.eup %734 }
 0x379   :  { %v737_v35 = vpop.eup %736 }
 0x381   :  { %v739_v41 = vpop.eup %738 }
 0x393   :  { %v238_v23 = vpop.f32.mrf.mxu0 }
 0x394   :  { %v245_v24 = vmul.f32 %v733_v22, %v238_v23 }
 0x395   :  { %v665_v25 = vpop.f32.mrf.mxu0 }
 0x396   :  { %246 = vst.msk [vmem:[#allocation8] sm:$0xff] %vm133_vm2, %v245_v24 }
 0x397   :  { %v241_v27 = vpop.f32.mrf.mxu0 }
 0x399   :  { %v666_v28 = vpop.f32.mrf.mxu0 }
 0x39f   :  { %v350_v30 = vpop.f32.mrf.mxu0 }
 0x3a0   :  { %v357_v31 = vmul.f32 %v735_v0, %v350_v30 }
 0x3a1   :  { %v677_v32 = vpop.f32.mrf.mxu0 }
 0x3a2   :  { %359 = vrot.lane.b32.xlu1 %v357_v31, %s840_s5 }
 0x3a3   :  { %v353_v33 = vpop.f32.mrf.mxu0 }
 0x3a5   :  { %v678_v34 = vpop.f32.mrf.mxu0 }
 0x3a7   :  { %v472_v36 = vpop.f32.mrf.mxu0 }
 0x3a8   :  { %v479_v37 = vmul.f32 %v737_v35, %v472_v36 }
 0x3a9   :  { %v689_v38 = vpop.f32.mrf.mxu0 }
 0x3aa   :  { %481 = vst.msk [vmem:[#allocation8 + $0x8] sm:$0xff] %vm133_vm2, %v479_v37 }
 0x3ab   :  { %v475_v39 = vpop.f32.mrf.mxu0 }
 0x3ad   :  { %v690_v40 = vpop.f32.mrf.mxu0 }
 0x3af   :  { %v585_v42 = vpop.f32.mrf.mxu0 }
 0x3b0   :  { %v592_v43 = vmul.f32 %v739_v41, %v585_v42 }
 0x3b1   :  { %v701_v44 = vpop.f32.mrf.mxu0 }
 0x3b2   :  { %594 = vrot.lane.b32.xlu0 %v592_v43, %s840_s5 }
 0x3b3   :  { %v588_v45 = vpop.f32.mrf.mxu0 }
 0x3b5   :  { %v702_v46 = vpop.f32.mrf.mxu0 }
 0x414   :  { %v360_v47 = vpop.permute.xlu1 %359 }
 0x415   :  { %363 = vst.msk [vmem:[#allocation8] sm:$0xff] %vm362_vm9, %v360_v47 }
 0x424   :  { %v595_v48 = vpop.permute.xlu0 %594 }
 0x425   :  { %597 = vst.msk [vmem:[#allocation8 + $0x8] sm:$0xff] %vm362_vm9, %v595_v48 }
 0x426   :  { %811 = shalt.err (!%p808_p5)
}
 0x427   :  { %s842_s9 = smov 128   ;;  %s843_s10 = smov 8  }
 0x428   :  { %609 = dma.vmem_to_hbm [thread:$0]  %s604_s7, 256, %s956_s3, [#allocation4], %s842_s9, %s842_s9, %s843_s10  }
 0x429   :  { %824 = dma.done.wait [#allocation4], 256  }
 0x42a   :  { %825 = vsyncadd [#allocation4], 4294967040 }
 0x42b   :  { %613 = vsyncpa [#allocation3], 1 }
 0x42c   :  { %614 = vsyncpa [#allocation6], 1 }
 0x42d   :  { %615 = vsyncpa [#allocation4], 1 }

</bundles_post_ra>
